<compile_context>
chip_gen: v7x
topology: tpu7x:2x2x1
jax: 0.10.0
libtpu: 0.0.40
codegen_flags: <defaults>
</compile_context>

<pallas_src>
import math
from dataclasses import dataclass
from functools import partial

import jax
import jax.numpy as jnp
from jax import lax
from jax.experimental import pallas as pl
from jax.experimental.pallas import tpu as pltpu

NONE = 1
WITH_AGGREGATOR = 2
WITH_ATTENTION = 3

_COMPILER_PARAMS = pltpu.CompilerParams(vmem_limit_bytes=32 * 1024 * 1024)
# TODO(synk): at reference scale (D_in = 4*(96*96+4) = 36880, ew1 ~ 5.9MB bf16) keep
#             ew1 fully VMEM-resident (fits v7x's 64MiB too) or K-tile with a grid
#             reduction axis; on v7x quantize ew1 to fp8 (e4m3) / on v5e-v6e to int8
#             with per-column scales to halve the dominant HBM weight read, and give
#             the batched encoder a parallel grid axis so v7x's second TensorCore is
#             used.  At this demo scale a single block fits comfortably.


# ----------------------------------------------------------------------------
# Pallas kernels
# ----------------------------------------------------------------------------
def _encoder_kernel(x_ref, w1_ref, w2_ref, b_ref, o_ref):
    """Encoder for ALL units and ALL (batched) timesteps in one shot.

    Layer-1 weights of every unit are concatenated along the output axis (shared
    input), layer-2 is block-diagonal; both matmuls are bf16 with f32 accumulation.
    The M dimension is T*B so the big ew1 read is amortized over the whole window.
    """
    x = x_ref[...].astype(jnp.bfloat16)
    h = jnp.dot(x, w1_ref[...], preferred_element_type=jnp.float32)
    h = jnp.maximum(h + b_ref[0:1, :h.shape[-1]], 0.0)
    o = jnp.dot(h.astype(jnp.bfloat16), w2_ref[...], preferred_element_type=jnp.float32)
    o_ref[...] = jnp.tanh(o + b_ref[1:2, :o.shape[-1]]).astype(o_ref.dtype)


def _rollout_kernel(xi_ref, xe_ref, mo_ref, ma0_ref,
                    aw1_ref, aw2_ref, watt_ref, bias_ref,
                    o_ref, att_sc):
    """Recurrent per-step path for T steps (grid axis 0 = time).

    Weight refs have constant index_maps -> fetched once, VMEM-resident for all T
    steps.  The attention memory (last step's attentions) is carried in VMEM scratch.
    All per-step outputs are packed into one lane-dense slab (single store / DMA).
    """
    f32, bf16 = jnp.float32, jnp.bfloat16
    t = pl.program_id(0)

    UD = aw2_ref.shape[1]          # U * dim_unit
    UHA = aw2_ref.shape[0]         # U * dim_hid_agg_unit
    UAU = ma0_ref.shape[1]         # U * dim_attention_unit
    AGW = watt_ref.shape[1]        # U*au + dim_attention_global
    M = ma0_ref.shape[0]           # attention memory length (= batch)
    B = xi_ref.shape[1]
    pad = o_ref.shape[2] - (2 * UD + AGW + M)

    @pl.when(t == 0)
    def _():
        att_sc[...] = ma0_ref[...]

    xi = xi_ref[0]                 # (B, UD)  cached enc outputs (intro delay)
    xe = xe_ref[0]                 # (B, UD)  cached enc outputs (inter delay)
    mem_out = mo_ref[0]            # (B, UD)  previous step's enc outputs
    mem_att = att_sc[...]          # (M, UAU) previous step's attentions

    # --- Aggregator: per-unit MLP over [intro, inter] (block-diag, fused) -----
    xin = jnp.concatenate([xi, xe], axis=-1).astype(bf16)
    h = jnp.tanh(jnp.dot(xin, aw1_ref[...], preferred_element_type=f32)
                 + bias_ref[0:1, :UHA])
    agg = jnp.tanh(jnp.dot(h.astype(bf16), aw2_ref[...], preferred_element_type=f32)
                   + bias_ref[1:2, :UD])

    # --- Hippocampus: fused per-unit + global attention projection ------------
    proj = jnp.tanh(jnp.dot(agg.astype(bf16), watt_ref[...],
                            preferred_element_type=f32)
                    + bias_ref[2:3, :AGW])
    att = proj[:, :UAU]
    gatt = proj[:, UAU:]

    # --- Memory softmax read-out ----------------------------------------------
    scores = lax.dot_general(att.astype(bf16), mem_att.astype(bf16),
                             (((1,), (1,)), ((), ())),
                             preferred_element_type=f32)
    scores = scores * (1.0 / math.sqrt(UAU))
    scores = scores - jnp.max(scores, axis=-1, keepdims=True)
    e = jnp.exp(scores)
    w = e / jnp.sum(e, axis=-1, keepdims=True)        # exact divide: returned tensor
    aout = jnp.dot(w.astype(bf16), mem_out.astype(bf16), preferred_element_type=f32)

    # --- recurrence update ------------------------------------------------------
    att_sc[...] = att

    # --- single lane-dense output slab ------------------------------------------
    pieces = [agg, aout, att, gatt, w]
    if pad:
        pieces.append(jnp.zeros((B, pad), f32))
    o_ref[0] = jnp.concatenate(pieces, axis=-1)


# ----------------------------------------------------------------------------
# pallas_call wrappers
# ----------------------------------------------------------------------------
def _encoder_call(x, p):
    N = x.shape[0]
    UD = p["ew2"].shape[1]
    return pl.pallas_call(
        _encoder_kernel,
        out_shape=jax.ShapeDtypeStruct((N, UD), jnp.float32),
        compiler_params=_COMPILER_PARAMS,
    )(x, p["ew1"], p["ew2"], p["enc_bias"])


def _rollout_call(cache_hist, mem_out_hist, mem_att0, p, t_intro, t_inter):
    T = mem_out_hist.shape[0]
    L = cache_hist.shape[0] - (T - 1)
    _, B, UD = cache_hist.shape
    UAU = mem_att0.shape[1]
    M = mem_att0.shape[0]
    AGW = p["watt"].shape[1]
    slab = -(-(2 * UD + AGW + M) // 128) * 128

    grid_spec = pltpu.PrefetchScalarGridSpec(
        num_scalar_prefetch=0,
        grid=(T,),
        in_specs=[
            pl.BlockSpec((1, B, UD), lambda t: (t + L - t_intro, 0, 0)),   # xi
            pl.BlockSpec((1, B, UD), lambda t: (t + L - t_inter, 0, 0)),   # xe
            pl.BlockSpec((1, B, UD), lambda t: (t, 0, 0)),                 # mem_out(t)
            pl.BlockSpec(mem_att0.shape, lambda t: (0, 0)),                # resident
            pl.BlockSpec(p["aw1"].shape, lambda t: (0, 0)),                # resident
            pl.BlockSpec(p["aw2"].shape, lambda t: (0, 0)),                # resident
            pl.BlockSpec(p["watt"].shape, lambda t: (0, 0)),               # resident
            pl.BlockSpec(p["bias"].shape, lambda t: (0, 0)),               # resident
        ],
        out_specs=pl.BlockSpec((1, B, slab), lambda t: (t, 0, 0)),
        scratch_shapes=[pltpu.VMEM((M, UAU), jnp.float32)],
    )
    return pl.pallas_call(
        _rollout_kernel,
        out_shape=jax.ShapeDtypeStruct((T, B, slab), jnp.float32),
        grid_spec=grid_spec,
        compiler_params=pltpu.CompilerParams(
            dimension_semantics=("arbitrary",),          # time axis is a recurrence
            vmem_limit_bytes=32 * 1024 * 1024),
    )(cache_hist, cache_hist, mem_out_hist, mem_att0,
      p["aw1"], p["aw2"], p["watt"], p["bias"])


# ----------------------------------------------------------------------------
# Jitted drivers (one dispatch per forward / per rollout)
# ----------------------------------------------------------------------------
_encode_jit = jax.jit(_encoder_call)


@partial(jax.jit, static_argnames=("t_intro", "t_inter", "uau"))
def _warmup_attn_jit(x, caches0, p, *, t_intro, t_inter, uau):
    # Warm-up bootstrap: aggregator + attentions from the caches, encoder on CLEAN
    # inputs; memory not formed yet -> zero memory, read-out discarded.
    enc = _encoder_call(x, p)
    B, UD = enc.shape
    slab = _rollout_call(caches0,
                         jnp.zeros((1, B, UD), jnp.float32),
                         jnp.zeros((B, uau), jnp.float32),
                         p, t_intro, t_inter)
    return enc, slab[0]


@partial(jax.jit, static_argnames=("t_intro", "t_inter"))
def _forward_steps_jit(xs, key, caches0, last_enc, last_att, p, *, t_intro, t_inter):
    """T real forward steps fused: noise + time-batched encoder + recurrent rollout."""
    T, B, D = xs.shape
    nx = xs + 0.2 * jax.random.normal(key, xs.shape, xs.dtype)
    enc_all = _encoder_call(nx.reshape(T * B, D), p).reshape(T, B, -1)
    cache_hist = jnp.concatenate([caches0, enc_all[:T - 1]], axis=0)
    mem_out_hist = jnp.concatenate([last_enc[None], enc_all[:T - 1]], axis=0)
    slabs = _rollout_call(cache_hist, mem_out_hist, last_att, p, t_intro, t_inter)
    return enc_all, slabs, mem_out_hist


# ----------------------------------------------------------------------------
# Parameter construction helpers
# ----------------------------------------------------------------------------
def _block_diag(mats):
    """(U, a, b) stack of per-unit weights -> (U*a, U*b) block-diagonal weight."""
    u, a, b = mats.shape
    out = jnp.zeros((u * a, u * b), mats.dtype)
    for i in range(u):
        out = out.at[i * a:(i + 1) * a, i * b:(i + 1) * b].set(mats[i])
    return out


# ----------------------------------------------------------------------------
# Model (stateful Python wrapper mirroring the PyTorch control flow)
# ----------------------------------------------------------------------------
@dataclass
class Opt:
    num_units_regions: tuple = (2, 3)
    dim_unit: int = 8
    dim_hid_enc_unit: int = 16
    dim_hid_agg_unit: int = 16
    dim_attention_global: int = 8
    dim_attention_unit: int = 4
    num_attention_groups: int = 2
    num_attention_splits: int = 1
    attention_mask_p: float = 0.0
    batch_size: int = 2
    t_intro_region: int = 1
    t_inter_region: int = 2
    max_bptt: int = 4
    mix_mode: int = NONE
    data_file: str = "synthetic"


class BrainLikeModel:
    def __init__(self, opt: Opt, dim_inputs: int, key):
        self.opt = opt
        self.num_units_regions = list(opt.num_units_regions)
        self.U = sum(self.num_units_regions)
        self.dim_unit = opt.dim_unit
        self.dim_inputs = dim_inputs
        self.t_intro_region = opt.t_intro_region
        self.t_inter_region = opt.t_inter_region
        self.mix_mode = opt.mix_mode
        self.blinded = False
        self.counter = 0
        self.caches = []                 # flat (B, U*d) cached outputs
        self.last_attentions = None      # flat (B, U*au)
        self.last_enc_outputs = None     # flat (B, U*d)

        U, d = self.U, opt.dim_unit
        He, Ha = opt.dim_hid_enc_unit, opt.dim_hid_agg_unit
        au, ag = opt.dim_attention_unit, opt.dim_attention_global
        keys = jax.random.split(key, 7)

        def init(k, shape, fan_in):
            return jax.random.normal(k, shape, jnp.float32) * (1.0 / math.sqrt(fan_in))

        # Encoder: per-unit 2-layer MLP (D_in -> He -> d); layer-1 weights concatenated
        # over units (shared input), layer-2 block-diagonal. bf16 weights.
        ew1 = init(keys[0], (dim_inputs, U * He), dim_inputs).astype(jnp.bfloat16)
        ew2 = _block_diag(init(keys[1], (U, He, d), He)).astype(jnp.bfloat16)
        # Aggregator: per-unit 2-layer MLP over [intro, inter] cached outputs
        # (2d -> Ha -> d); intro/inter layer-1 weights fused into one (2*U*d, U*Ha).
        # TODO(synk): the reference Aggregator keeps recurrent BPTT state (max_bptt /
        #             reset()); its internals are not in the snippet, so it is
        #             implemented as a feed-forward per-unit MLP here.
        aw1i = _block_diag(init(keys[2], (U, d, Ha), 2 * d))
        aw1e = _block_diag(init(keys[3], (U, d, Ha), 2 * d))
        aw1 = jnp.concatenate([aw1i, aw1e], axis=0).astype(jnp.bfloat16)
        aw2 = _block_diag(init(keys[4], (U, Ha, d), Ha)).astype(jnp.bfloat16)
        # Hippocampus: per-unit attention (d -> au) and global attention (U*d -> ag)
        # fused into one projection; softmax read-out over the stored batch memory.
        # TODO(synk): num_attention_groups / num_attention_splits / mask_p unused
        #             because the Hippocampus internals are not in the provided snippet.
        wu = _block_diag(init(keys[5], (U, d, au), d))
        wg = init(keys[6], (U * d, ag), U * d)
        watt = jnp.concatenate([wu, wg], axis=1).astype(jnp.bfloat16)

        enc_bpad = max(128, -(-max(U * He, U * d) // 128) * 128)
        bpad = max(128, -(-max(U * Ha, U * d, U * au + ag) // 128) * 128)
        self.params = {
            "ew1": ew1, "ew2": ew2,
            "enc_bias": jnp.zeros((2, enc_bpad), jnp.float32),   # [eb1 | eb2] packed
            "aw1": aw1, "aw2": aw2, "watt": watt,
            "bias": jnp.zeros((3, bpad), jnp.float32),           # [ab1 | ab2 | b_att]
        }

    # ---- helpers ------------------------------------------------------------
    def encoder(self, inputs):
        return _encode_jit(inputs, self.params)      # flat (N, U*d)

    def _split(self, slab):
        UD = self.U * self.dim_unit
        UAU = self.U * self.opt.dim_attention_unit
        AG = self.opt.dim_attention_global
        M = self.opt.batch_size
        o = 0
        agg = slab[..., o:o + UD]; o += UD
        aout = slab[..., o:o + UD]; o += UD
        att = slab[..., o:o + UAU]; o += UAU
        gatt = slab[..., o:o + AG]; o += AG
        w = slab[..., o:o + M]
        return agg, aout, att, gatt, w

    def reset(self):
        self.caches.clear()
        self.last_attentions = None

    # ---- Model.warm_up mirror ------------------------------------------------
    def warm_up(self, inputs):
        if len(self.caches) < max(self.t_intro_region, self.t_inter_region):
            self.caches.append(self.encoder(inputs))
            return True
        elif self.last_attentions is None:
            caches0 = jnp.stack(self.caches, axis=0)
            enc, slab = _warmup_attn_jit(
                inputs, caches0, self.params,
                t_intro=self.t_intro_region, t_inter=self.t_inter_region,
                uau=self.U * self.opt.dim_attention_unit)
            _agg, _aout, att, _gatt, _w = self._split(slab)
            self.last_attentions = att
            self.last_enc_outputs = enc
            self.caches.append(enc)
            self.caches.pop(0)
            return True
        return False

    # ---- Model.forward mirror (single step) -----------------------------------
    def forward(self, inputs, noise_key):
        if self.warm_up(inputs):
            return None

        B = inputs.shape[0]
        mem_out_flat = self.last_enc_outputs
        caches0 = jnp.stack(self.caches, axis=0)

        enc_all, slabs, _ = _forward_steps_jit(
            inputs[None], noise_key, caches0, mem_out_flat, self.last_attentions,
            self.params, t_intro=self.t_intro_region, t_inter=self.t_inter_region)
        enc_flat = enc_all[0]
        agg_flat, aout_flat, att_flat, gatt, weights, = self._split(slabs[0])

        if not self.blinded:
            enc_pub = enc_flat
            self.last_attentions = att_flat
            self.last_enc_outputs = enc_flat
        elif self.opt.mix_mode == WITH_AGGREGATOR:
            enc_pub = agg_flat
        elif self.opt.mix_mode == WITH_ATTENTION:
            enc_pub = aout_flat
        else:
            raise ValueError("If is blinded, the model must has been trained on mix-mode 2 or 3")

        self.counter += 1
        if self.mix_mode == NONE or self.counter % 2 == 0:
            self.caches.append(enc_pub)
        elif self.mix_mode == WITH_AGGREGATOR:
            self.caches.append(agg_flat)
        elif self.mix_mode == WITH_ATTENTION:
            self.caches.append(aout_flat)
        else:
            raise ValueError("Invalid mix_mode!!")
        self.caches.pop(0)

        U, d = self.U, self.dim_unit
        as_bud = lambda t: t.reshape(B, U, d)
        return ((as_bud(enc_pub), as_bud(agg_flat), as_bud(aout_flat), as_bud(mem_out_flat)),
                att_flat.reshape(B, U, -1), weights, gatt)

    # ---- Fused multi-step rollout (weights VMEM-resident across T steps) ------
    def forward_rollout(self, xs, noise_key):
        """T real forward steps in ONE pallas_call over a time grid.

        Valid only past warm-up, with mix_mode==NONE and not blinded (the cache
        contents are then a pure function of the enc-output history -> no Python
        per-step branching is needed)."""
        assert self.mix_mode == NONE and not self.blinded
        assert self.last_attentions is not None, "finish warm-up first"
        T, B, _ = xs.shape
        caches0 = jnp.stack(self.caches, axis=0)

        enc_all, slabs, mem_hist = _forward_steps_jit(
            xs, noise_key, caches0, self.last_enc_outputs, self.last_attentions,
            self.params, t_intro=self.t_intro_region, t_inter=self.t_inter_region)
        agg, aout, att, gatt, w = self._split(slabs)

        # state update (per-step append/pop collapsed)
        hist = jnp.concatenate([caches0, enc_all], axis=0)
        L = caches0.shape[0]
        self.caches = [hist[i] for i in range(hist.shape[0] - L, hist.shape[0])]
        self.last_enc_outputs = enc_all[-1]
        self.last_attentions = att[-1]
        self.counter += T

        U, d = self.U, self.dim_unit
        shp = lambda a: a.reshape(T, B, U, d)
        return ((shp(enc_all), shp(agg), shp(aout), shp(mem_hist)),
                att.reshape(T, B, U, -1), w, gatt)


# ----------------------------------------------------------------------------
if __name__ == "__main__":
    opt = Opt()
    S = 16                               # downscaled from 96 for a small demo
    dim_inputs = 4 * (S * S + 4)         # = 1040  (reference: 4*(96*96+4))
    B = opt.batch_size

    root = jax.random.PRNGKey(0)
    param_key, data_key = jax.random.split(root)
    model = BrainLikeModel(opt, dim_inputs, param_key)

    # ---- warm-up (cache fill + attention bootstrap) --------------------------
    n_warm = max(opt.t_intro_region, opt.t_inter_region) + 1
    for _ in range(n_warm):
        data_key, kx, kn = jax.random.split(data_key, 3)
        x = jax.random.normal(kx, (B, dim_inputs), jnp.float32)
        assert model.forward(x, kn) is None

    U, d = sum(opt.num_units_regions), opt.dim_unit

    # ---- one per-step forward (mirrors PyTorch Model.forward) ----------------
    data_key, kx, kn = jax.random.split(data_key, 3)
    x = jax.random.normal(kx, (B, dim_inputs), jnp.float32)
    out = model.forward(x, kn)
    assert out is not None
    (enc_o, agg_o, att_o, mem_o), attentions, weights, gatt = out
    assert enc_o.shape == (B, U, d) and agg_o.shape == (B, U, d)
    assert att_o.shape == (B, U, d) and mem_o.shape == (B, U, d)
    assert attentions.shape == (B, U, opt.dim_attention_unit)
    assert weights.shape == (B, B) and gatt.shape == (B, opt.dim_attention_global)

    # ---- fused multi-step rollout (weights stay VMEM-resident over T) --------
    T = 3
    data_key, kx, kn = jax.random.split(data_key, 3)
    xs = jax.random.normal(kx, (T, B, dim_inputs), jnp.float32)
    rout = model.forward_rollout(xs, kn)
    (enc_r, agg_r, att_r, mem_r), attn_r, w_r, gatt_r = rout

    jax.block_until_ready((enc_o, agg_o, att_o, mem_o, attentions, weights, gatt,
                           enc_r, agg_r, att_r, mem_r, attn_r, w_r, gatt_r))
    assert enc_r.shape == (T, B, U, d) and agg_r.shape == (T, B, U, d)
    assert att_r.shape == (T, B, U, d) and mem_r.shape == (T, B, U, d)
    assert attn_r.shape == (T, B, U, opt.dim_attention_unit)
    assert w_r.shape == (T, B, B)
    assert gatt_r.shape == (T, B, opt.dim_attention_global)
    print("KERNEL_OK")
</pallas_src>

<mosaic_0001>
module attributes {stable_mosaic.version = 11 : i64} {
  func.func @_encoder_kernel(%arg0: memref<2x1040xf32, #tpu.memory_space<vmem>>, %arg1: memref<1040x80xbf16, #tpu.memory_space<vmem>>, %arg2: memref<80x40xbf16, #tpu.memory_space<vmem>>, %arg3: memref<2x128xf32, #tpu.memory_space<vmem>>, %arg4: memref<2x40xf32, #tpu.memory_space<vmem>>) attributes {dimension_semantics = [], scalar_prefetch = 0 : i64, scratch_operands = 0 : i64, tpu.core_type = #tpu.core_type<tc>} {
    %c0 = arith.constant 0 : index
    %c0_0 = arith.constant 0 : index
    %0 = vector.load %arg0[%c0, %c0_0] : memref<2x1040xf32, #tpu.memory_space<vmem>>, vector<2x1040xf32>
    %1 = arith.truncf %0 : vector<2x1040xf32> to vector<2x1040xbf16>
    %c0_1 = arith.constant 0 : index
    %c0_2 = arith.constant 0 : index
    %2 = vector.load %arg1[%c0_1, %c0_2] : memref<1040x80xbf16, #tpu.memory_space<vmem>>, vector<1040x80xbf16>
    %cst = arith.constant dense<0.000000e+00> : vector<2x80xf32>
    %3 = tpu.matmul %1, %2, %cst {dimension_numbers = #tpu.dot_dimension_numbers<[1], [0], [0], [1], [0, 0, 1, 1], [], []>} : vector<2x1040xbf16>, vector<1040x80xbf16>, vector<2x80xf32> -> vector<2x80xf32>
    %c0_3 = arith.constant 0 : index
    %c0_4 = arith.constant 0 : index
    %4 = vector.load %arg3[%c0_3, %c0_4] : memref<2x128xf32, #tpu.memory_space<vmem>>, vector<1x80xf32>
    %5 = vector.broadcast %4 : vector<1x80xf32> to vector<2x80xf32>
    %6 = arith.addf %3, %5 : vector<2x80xf32>
    %cst_5 = arith.constant 0.000000e+00 : f32
    %7 = vector.broadcast %cst_5 : f32 to vector<2x80xf32>
    %8 = arith.maximumf %6, %7 : vector<2x80xf32>
    %9 = arith.truncf %8 : vector<2x80xf32> to vector<2x80xbf16>
    %c0_6 = arith.constant 0 : index
    %c0_7 = arith.constant 0 : index
    %10 = vector.load %arg2[%c0_6, %c0_7] : memref<80x40xbf16, #tpu.memory_space<vmem>>, vector<80x40xbf16>
    %cst_8 = arith.constant dense<0.000000e+00> : vector<2x40xf32>
    %11 = tpu.matmul %9, %10, %cst_8 {dimension_numbers = #tpu.dot_dimension_numbers<[1], [0], [0], [1], [0, 0, 1, 1], [], []>} : vector<2x80xbf16>, vector<80x40xbf16>, vector<2x40xf32> -> vector<2x40xf32>
    %c1 = arith.constant 1 : index
    %c0_9 = arith.constant 0 : index
    %12 = vector.load %arg3[%c1, %c0_9] : memref<2x128xf32, #tpu.memory_space<vmem>>, vector<1x40xf32>
    %13 = vector.broadcast %12 : vector<1x40xf32> to vector<2x40xf32>
    %14 = arith.addf %11, %13 : vector<2x40xf32>
    %15 = math.tanh %14 : vector<2x40xf32>
    %c0_10 = arith.constant 0 : index
    %c0_11 = arith.constant 0 : index
    %16 = vector.load %arg4[%c0_10, %c0_11] : memref<2x40xf32, #tpu.memory_space<vmem>>, vector<2x40xf32>
    tpu.vector_store %arg4[%c0_10, %c0_11], %15 {strides = array<i32>} : memref<2x40xf32, #tpu.memory_space<vmem>>, vector<2x40xf32>,
    return
  }
}

</mosaic_0001>

<bundles_post_ra>
// kernel: _encoder_call.1
= control target key start
LH: loop header
LB: loop body
LE: loop exit
PB: predicated region body
PF: predicated region fallthrough
CT: control target
= control target key end

     0   :  { %v29_v28 = vlaneseq  ;;  %v1214_v36 = vmov 1983009808   ;;  %s1486_s0 = inlined_call_operand.vmem [shape: f32[2,1040], index: 0, kind: input, shape index: {}]   ;;  %s1487_s1 = inlined_call_operand.vmem [shape: bf16[1040,80], index: 1, kind: input, shape index: {}]   ;;  %s1488_s2 = inlined_call_operand.vmem [shape: bf16[80,40], index: 2, kind: input, shape index: {}]   ;;  %s1489_s3 = inlined_call_operand.vmem [shape: f32[2,128], index: 3, kind: input, shape index: {}]   ;;  %s1490_s4 = inlined_call_operand.hbm [shape: f32[2,40], index: 4, kind: output, shape index: {}]  }
   0x1   :  { %v1116_v0 = vld [vmem:[%s1487_s1 + $0x40] sm:$0xff]   ;;  %v1120_v4 = vld [vmem:[%s1487_s1 + $0x48] sm:$0xff]   ;;  %v1124_v8 = vld [vmem:[%s1487_s1 + $0x50] sm:$0xff]   ;;  %v27_v37 = vunpack.c.l.s4 %v1214_v36 }
   0x2   :  { %v1117_v1 = vld [vmem:[%s1487_s1] sm:$0xff]   ;;  %996 = vmatprep.subr.bf16.mxu0 %v1116_v0  ;;  %v1121_v5 = vld [vmem:[%s1487_s1 + $0x8] sm:$0xff]   ;;  %v1125_v9 = vld [vmem:[%s1487_s1 + $0x10] sm:$0xff]   ;;  %v30_v33 = vshrl.u32 %v29_v28, 7 }
   0x3   :  { %v1118_v2 = vld [vmem:[%s1487_s1 + $0xc0] sm:$0xff]   ;;  %997 = vmatpush3.bf16.msra.mxu0 %v1117_v1  ;;  %v1122_v6 = vld [vmem:[%s1487_s1 + $0xc8] sm:$0xff]   ;;  %v1126_v10 = vld [vmem:[%s1487_s1 + $0xd0] sm:$0xff]   ;;  %v28_v38 = vunpack.c.0.s8 %v27_v37 }
   0x4   :  { %v1119_v3 = vld [vmem:[%s1487_s1 + $0x80] sm:$0xff]   ;;  %1018 = vmatprep.subr.bf16.mxu1 %v1118_v2  ;;  %998 = vmatprep.subr.bf16.mxu0 %v1120_v4  ;;  %v1123_v7 = vld [vmem:[%s1487_s1 + $0x88] sm:$0xff]   ;;  %v1127_v11 = vld [vmem:[%s1487_s1 + $0x90] sm:$0xff]  }
   0x5   :  { %1019 = vmatpush3.bf16.msra.mxu1 %v1119_v3  ;;  %v1128_v12 = vld [vmem:[%s1487_s1 + $0x58] sm:$0xff]   ;;  %v1132_v16 = vld [vmem:[%s1487_s1 + $0x60] sm:$0xff]   ;;  %v1136_v20 = vld [vmem:[%s1487_s1 + $0x68] sm:$0xff]   ;;  %v1348_v41 = vsub.s32 %v28_v38, %v30_v33 }
   0x6   :  { %1020 = vmatprep.subr.bf16.mxu1 %v1122_v6  ;;  %v1129_v13 = vld [vmem:[%s1487_s1 + $0x18] sm:$0xff]   ;;  %v1133_v17 = vld [vmem:[%s1487_s1 + $0x20] sm:$0xff]   ;;  %v1137_v21 = vld [vmem:[%s1487_s1 + $0x28] sm:$0xff]  }
   0x7   :  { %999 = vmatpush3.bf16.msra.mxu0 %v1121_v5  ;;  %v1130_v14 = vld [vmem:[%s1487_s1 + $0xd8] sm:$0xff]   ;;  %v1134_v18 = vld [vmem:[%s1487_s1 + $0xe0] sm:$0xff]   ;;  %v1138_v22 = vld [vmem:[%s1487_s1 + $0xe8] sm:$0xff]  }
   0x8   :  { %1000 = vmatprep.subr.bf16.mxu0 %v1124_v8  ;;  %v1131_v15 = vld [vmem:[%s1487_s1 + $0x98] sm:$0xff]   ;;  %v1135_v19 = vld [vmem:[%s1487_s1 + $0xa0] sm:$0xff]   ;;  %v1139_v23 = vld [vmem:[%s1487_s1 + $0xa8] sm:$0xff]  }
   0x9   :  { %1021 = vmatpush3.bf16.msra.mxu1 %v1123_v7  ;;  %v1140_v24 = vld [vmem:[%s1487_s1 + $0x70] sm:$0xff]   ;;  %v1144_v29 = vld [vmem:[%s1487_s1 + $0x78] sm:$0xff]   ;;  %v19_v34 = vld [vmem:[%s1486_s0] sm:$0xff] }
   0xa   :  { %1022 = vmatprep.subr.bf16.mxu1 %v1126_v10  ;;  %v1141_v25 = vld [vmem:[%s1487_s1 + $0x30] sm:$0xff]   ;;  %v1145_v30 = vld [vmem:[%s1487_s1 + $0x38] sm:$0xff]   ;;  %v1148_v35 = vld [vmem:[%s1487_s1 + $0x140] sm:$0xff]   ;;  %v25_v39 = vcombine.high %v19_v34, %v19_v34  ;;  %v32_v42 = vrot.slane %v19_v34, %v1348_v41 }
   0xb   :  { %1001 = vmatpush3.bf16.msra.mxu0 %v1125_v9  ;;  %v1142_v26 = vld [vmem:[%s1487_s1 + $0xf0] sm:$0xff]   ;;  %v1146_v31 = vld [vmem:[%s1487_s1 + $0xf8] sm:$0xff]   ;;  %v1151_v40 = vld [vmem:[%s1487_s1 + $0x1c0] sm:$0xff]  }
   0xc   :  { %1002 = vmatprep.subr.bf16.mxu0 %v1128_v12  ;;  %v1143_v27 = vld [vmem:[%s1487_s1 + $0xb0] sm:$0xff]   ;;  %v1147_v32 = vld [vmem:[%s1487_s1 + $0xb8] sm:$0xff]   ;;  %v39_v43 = vrot.slane %v25_v39, %v1348_v41  ;;  %v40_v44 = vcombine.high %v32_v42, %v32_v42  ;;  %v1150_v46 = vld [vmem:[%s1487_s1 + $0x100] sm:$0xff]   ;;  %v75_v47 = vpack.c.bf16 %v32_v42, %v32_v42 }
   0xd   :  { %1023 = vmatpush3.bf16.msra.mxu1 %v1127_v11  ;;  %v1152_v49 = vld [vmem:[%s1487_s1 + $0x180] sm:$0xff]   ;;  %v1153_v52 = vld [vmem:[%s1487_s1 + $0x148] sm:$0xff]   ;;  %v1157_v56 = vld [vmem:[%s1487_s1 + $0x150] sm:$0xff]  }
   0xe   :  { %1024 = vmatprep.subr.bf16.mxu1 %v1130_v14  ;;  %v41_v45 = vcombine.high %v39_v43, %v39_v43  ;;  %v77_v48 = vpack.c.bf16 %v39_v43, %v39_v43  ;;  %v76_v50 = vpack.c.bf16 %v40_v44, %v40_v44  ;;  %v1155_v53 = vld [vmem:[%s1487_s1 + $0x1c8] sm:$0xff]   ;;  %v1159_v57 = vld [vmem:[%s1487_s1 + $0x1d0] sm:$0xff]   ;;  %v1161_v60 = vld [vmem:[%s1487_s1 + $0x158] sm:$0xff]  }
   0xf   :  { %1003 = vmatpush3.bf16.msra.mxu0 %v1129_v13  ;;  %v1154_v54 = vld [vmem:[%s1487_s1 + $0x108] sm:$0xff]   ;;  %v1158_v58 = vld [vmem:[%s1487_s1 + $0x110] sm:$0xff]   ;;  %v1163_v61 = vld [vmem:[%s1487_s1 + $0x1d8] sm:$0xff]  }
  0x10   :  { %1004 = vmatprep.subr.bf16.mxu0 %v1132_v16  ;;  %v78_v51 = vpack.c.bf16 %v41_v45, %v41_v45  ;;  %645 = vmatprep.mubr.bf16.mxu0 %v76_v50  ;;  %v1156_v55 = vld [vmem:[%s1487_s1 + $0x188] sm:$0xff]   ;;  %v1160_v59 = vld [vmem:[%s1487_s1 + $0x190] sm:$0xff]   ;;  %v1162_v62 = vld [vmem:[%s1487_s1 + $0x118] sm:$0xff]  }
  0x11   :  { %1025 = vmatpush3.bf16.msra.mxu1 %v1131_v15  ;;  %v1164_v63 = vld [vmem:[%s1487_s1 + $0x198] sm:$0xff]   ;;  %v1165_v0 = vld [vmem:[%s1487_s1 + $0x160] sm:$0xff]   ;;  %v1169_v4 = vld [vmem:[%s1487_s1 + $0x168] sm:$0xff]  }
  0x12   :  { %1026 = vmatprep.subr.bf16.mxu1 %v1134_v18  ;;  %685 = vmatprep.mubr.bf16.mxu1 %v78_v51  ;;  %v1167_v1 = vld [vmem:[%s1487_s1 + $0x1e0] sm:$0xff]   ;;  %v1171_v5 = vld [vmem:[%s1487_s1 + $0x1e8] sm:$0xff]   ;;  %v1173_v8 = vld [vmem:[%s1487_s1 + $0x170] sm:$0xff]  }
  0x13   :  { %1005 = vmatpush3.bf16.msra.mxu0 %v1133_v17  ;;  %v1166_v2 = vld [vmem:[%s1487_s1 + $0x120] sm:$0xff]   ;;  %v1170_v6 = vld [vmem:[%s1487_s1 + $0x128] sm:$0xff]   ;;  %v1175_v9 = vld [vmem:[%s1487_s1 + $0x1f0] sm:$0xff]  }
  0x14   :  { %1006 = vmatprep.subr.bf16.mxu0 %v1136_v20  ;;  %v1168_v3 = vld [vmem:[%s1487_s1 + $0x1a0] sm:$0xff]   ;;  %v1172_v7 = vld [vmem:[%s1487_s1 + $0x1a8] sm:$0xff]   ;;  %v1174_v11 = vld [vmem:[%s1487_s1 + $0x130] sm:$0xff]  }
  0x15   :  { %1027 = vmatpush3.bf16.msra.mxu1 %v1135_v19  ;;  %v20_v10 = vld [vmem:[%s1486_s0 + $0x8] sm:$0xff]  ;;  %v1176_v12 = vld [vmem:[%s1487_s1 + $0x1b0] sm:$0xff]   ;;  %v1177_v15 = vld [vmem:[%s1487_s1 + $0x178] sm:$0xff]  }
  0x16   :  { %1028 = vmatprep.subr.bf16.mxu1 %v1138_v22  ;;  %v49_v13 = vrot.slane %v20_v10, %v1348_v41  ;;  %v42_v14 = vcombine.high %v20_v10, %v20_v10  ;;  %v1179_v16 = vld [vmem:[%s1487_s1 + $0x1f8] sm:$0xff]  }
  0x17   :  { %1007 = vmatpush3.bf16.msra.mxu0 %v1137_v21 }
  0x18   :  { %1008 = vmatprep.subr.bf16.mxu0 %v1140_v24  ;;  %v57_v17 = vcombine.high %v49_v13, %v49_v13  ;;  %v56_v18 = vrot.slane %v42_v14, %v1348_v41 }
  0x19   :  { %1029 = vmatpush3.bf16.msra.mxu1 %v1139_v23 }
  0x1a   :  { %1030 = vmatprep.subr.bf16.mxu1 %v1142_v26  ;;  %v80_v19 = vpack.c.bf16 %v57_v17, %v57_v17  ;;  %v58_v20 = vcombine.high %v56_v18, %v56_v18 }
  0x1b   :  { %1009 = vmatpush3.bf16.msra.mxu0 %v1141_v25 }
  0x1c   :  { %1010 = vmatprep.subr.bf16.mxu0 %v1144_v29 }
  0x1d   :  { %1031 = vmatpush3.bf16.msra.mxu1 %v1143_v27 }
  0x1e   :  { %1032 = vmatprep.subr.bf16.mxu1 %v1146_v31 }
  0x1f   :  { %1011 = vmatpush3.bf16.msra.mxu0 %v1145_v30 }
  0x20   :  { %1040 = vmatprep.subr.bf16.mxu0 %v1148_v35 }
  0x21   :  { %1033 = vmatpush3.bf16.msra.mxu1 %v1147_v32 }
  0x22   :  { %1062 = vmatprep.subr.bf16.mxu1 %v1151_v40  ;;  %646 = vmatmul.mubr.bf16.vlgmr.msra.gmra.mrb[0].mxu0 %v75_v47 }
  0x23   :  { %1041 = vmatpush3.bf16.msra.mxu0 %v1150_v46 }
  0x24   :  { %686 = vmatmul.mubr.bf16.vlgmr.msra.gmra.mrb[0].mxu1 %v77_v48  ;;  %1042 = vmatprep.subr.bf16.mxu0 %v1153_v52 }
  0x25   :  { %1063 = vmatpush3.bf16.msra.mxu1 %v1152_v49 }
  0x26   :  { %1064 = vmatprep.subr.bf16.mxu1 %v1155_v53 }
  0x27   :  { %1043 = vmatpush3.bf16.msra.mxu0 %v1154_v54 }
  0x28   :  { %1044 = vmatprep.subr.bf16.mxu0 %v1157_v56 }
  0x29   :  { %1065 = vmatpush3.bf16.msra.mxu1 %v1156_v55 }
  0x2a   :  { %1066 = vmatprep.subr.bf16.mxu1 %v1159_v57 }
  0x2b   :  { %1045 = vmatpush3.bf16.msra.mxu0 %v1158_v58 }
  0x2c   :  { %1046 = vmatprep.subr.bf16.mxu0 %v1161_v60 }
  0x2d   :  { %1067 = vmatpush3.bf16.msra.mxu1 %v1160_v59 }
  0x2e   :  { %1068 = vmatprep.subr.bf16.mxu1 %v1163_v61 }
  0x2f   :  { %1047 = vmatpush3.bf16.msra.mxu0 %v1162_v62 }
  0x30   :  { %1048 = vmatprep.subr.bf16.mxu0 %v1165_v0 }
  0x31   :  { %1069 = vmatpush3.bf16.msra.mxu1 %v1164_v63 }
  0x32   :  { %1070 = vmatprep.subr.bf16.mxu1 %v1167_v1 }
  0x33   :  { %1049 = vmatpush3.bf16.msra.mxu0 %v1166_v2 }
  0x34   :  { %1050 = vmatprep.subr.bf16.mxu0 %v1169_v4 }
  0x35   :  { %1071 = vmatpush3.bf16.msra.mxu1 %v1168_v3 }
  0x36   :  { %1072 = vmatprep.subr.bf16.mxu1 %v1171_v5 }
  0x37   :  { %1051 = vmatpush3.bf16.msra.mxu0 %v1170_v6 }
  0x38   :  { %1052 = vmatprep.subr.bf16.mxu0 %v1173_v8 }
  0x39   :  { %1073 = vmatpush3.bf16.msra.mxu1 %v1172_v7 }
  0x3a   :  { %1074 = vmatprep.subr.bf16.mxu1 %v1175_v9 }
  0x3b   :  { %9 = vsyncpa [#allocation3], 0  ;;  %1053 = vmatpush3.bf16.msra.mxu0 %v1174_v11  ;;  %v1178_v21 = vld [vmem:[%s1487_s1 + $0x138] sm:$0xff]   ;;  %v82_v23 = vpack.c.bf16 %v58_v20, %v58_v20  ;;  %725 = vmatprep.mubr.bf16.mxu0 %v80_v19  ;;  %v79_v24 = vpack.c.bf16 %v49_v13, %v49_v13  ;;  %v81_v25 = vpack.c.bf16 %v56_v18, %v56_v18  ;;  %v1182_v26 = vld [vmem:[%s1487_s1 + $0x200] sm:$0xff]   ;;  %v1215_v27 = vmov 0.0   ;;  %s1217_s6 = smov [#allocation2]  }
  0x3c   :  { %v1180_v22 = vld [vmem:[%s1487_s1 + $0x1b8] sm:$0xff]   ;;  %1054 = vmatprep.subr.bf16.mxu0 %v1177_v15  ;;  %vm1216_vm0 = vmmov 0   ;;  %v921_v28 = vld.sshfl [vmem:[%s1486_s0 + $0x10] sm:$0x3 pattern:$0x76325410] }
  0x3d   :  { %1075 = vmatpush3.bf16.msra.mxu1 %v1176_v12  ;;  %765 = vmatprep.mubr.bf16.mxu1 %v82_v23  ;;  %v83_v29 = vpack.c.bf16 %v921_v28, %v921_v28  ;;  %vm609_vm1 = vcmask 130048   ;;  %v1183_v30 = vld [vmem:[%s1488_s2] sm:$0xff]   ;;  %v1184_v31 = vld [vmem:[%s1488_s2 + $0x8] sm:$0xff]   ;;  %v1185_v32 = vld [vmem:[%s1488_s2 + $0x10] sm:$0xff]   ;;  %vm860_vm2 = vcmask 654336   ;;  %s913_s7 = sshll.u32 %s1217_s6, 4  ;;  %s914_s7 = int_to_ptr.vmem [resolvable:$true] %s913_s7 }
  0x3e   :  { %1076 = vmatprep.subr.bf16.mxu1 %v1179_v16  ;;  %v1186_v33 = vld [vmem:[%s1488_s2 + $0x18] sm:$0xff]   ;;  %v1187_v34 = vld [vmem:[%s1488_s2 + $0x20] sm:$0xff]   ;;  %vm905_vm3 = vcmask 320512   ;;  %s1190_s8 = scalar_lea.vmem %s914_s7, 32  ;;  %p1195_p1 = scmp.lt.s32.totalorder %s914_s7, %s914_s7 }
  0x3f   :  { %1055 = vmatpush3.bf16.msra.mxu0 %v1178_v21  ;;  %v922_v37 = vld [vmem:[%s1489_s3] ss:$0 sm:$0xff]  ;;  %v989_v3 = vld [vmem:[%s1489_s3 + $0x1] ss:$0 sm:$0xff]  ;;  %p1191_p0 = scmp.ne.s32.totalorder %s914_s7, %s1190_s8  ;;  %p1196_p2 = scmp.lt.s32.totalorder %s1190_s8, %s1190_s8 }
  0x40   :  { %1092 = vmatprep.subr.bf16.mxu0 %v1215_v27 }
  0x41   :  { %1077 = vmatpush3.bf16.msra.mxu1 %v1180_v22  ;;  %p1197_p3 = por %p1196_p2, %p1195_p1 }
  0x42   :  { %1098 = vmatprep.subr.bf16.mxu1 %v1215_v27  ;;  %726 = vmatmul.mubr.bf16.vlgmr.msra.gmra.mrb[4].mxu0 %v79_v24 }
  0x43   :  { %1093 = vmatpush3.bf16.msra.mxu0 %v1182_v26  ;;  %1094 = vmatprep.mubr.msk.bf16.mxu0 %vm1216_vm0, %v1215_v27  ;;  %p1198_p4 = pnand %p1197_p3, %p1191_p0 }
  0x44   :  { %766 = vmatmul.mubr.bf16.vlgmr.msra.gmra.mrb[4].mxu1 %v81_v25 }
  0x45   :  { %1108 = vmatprep.mubr.msk.bf16.mxu1 %vm1216_vm0, %v1215_v27  ;;  %1099 = vmatpush3.bf16.msra.mxu1 %v1183_v30 }
  0x46   :  { %1100 = vmatprep.subr.bf16.mxu1 %v1215_v27 }
  0x49   :  { %1101 = vmatpush3.bf16.msra.mxu1 %v1184_v31 }
  0x4a   :  { %1095 = vmatmul.mubr.msk.bf16.vlgmr.msra.gmra.mrb[8].mxu0 %vm609_vm1, %v83_v29  ;;  %1102 = vmatprep.subr.bf16.mxu1 %v1215_v27 }
  0x4d   :  { %1103 = vmatpush3.bf16.msra.mxu1 %v1185_v32 }
  0x4e   :  { %1104 = vmatprep.subr.bf16.mxu1 %v1215_v27 }
  0x51   :  { %1105 = vmatpush3.bf16.msra.mxu1 %v1186_v33 }
  0x52   :  { %1106 = vmatprep.subr.bf16.mxu1 %v1215_v27 }
  0x55   :  { %1107 = vmatpush3.bf16.msra.mxu1 %v1187_v34 }
  0xf5   :  { %v1012_v35 = vpop.f32.mrb[0].mxu0 }
  0xf6   :  { %v1013_v38 = vpop.f32.mrb[1].mxu0 }
  0xf7   :  { %v1034_v36 = vpop.f32.mrb[0].mxu1  ;;  %v1014_v40 = vadd.f32 %v1013_v38, %v1012_v35  ;;  %v1015_v41 = vpop.f32.mrb[2].mxu0 }
  0xf8   :  { %v1035_v39 = vpop.f32.mrb[1].mxu1  ;;  %v1016_v44 = vpop.f32.mrb[3].mxu0 }
  0xf9   :  { %v1036_v42 = vadd.f32 %v1035_v39, %v1034_v36  ;;  %v1037_v43 = vpop.f32.mrb[2].mxu1  ;;  %v648_v46 = vadd.f32 %v1014_v40, %v922_v37 }
  0xfa   :  { %v1038_v45 = vpop.f32.mrb[3].mxu1 }
  0xfb   :  { %v688_v47 = vadd.f32 %v1036_v42, %v648_v46 }
 0x115   :  { %v1056_v48 = vpop.f32.mrb[4].mxu0 }
 0x116   :  { %v1057_v50 = vpop.f32.mrb[5].mxu0 }
 0x117   :  { %v1078_v49 = vpop.f32.mrb[4].mxu1  ;;  %v1058_v52 = vadd.f32 %v1057_v50, %v1056_v48  ;;  %v1059_v53 = vpop.f32.mrb[6].mxu0 }
 0x118   :  { %v1079_v51 = vpop.f32.mrb[5].mxu1  ;;  %v1060_v56 = vpop.f32.mrb[7].mxu0 }
 0x119   :  { %v1080_v54 = vadd.f32 %v1079_v51, %v1078_v49  ;;  %v1081_v55 = vpop.f32.mrb[6].mxu1  ;;  %v728_v58 = vadd.f32 %v1058_v52, %v688_v47 }
 0x11a   :  { %v1082_v57 = vpop.f32.mrb[7].mxu1 }
 0x11b   :  { %v768_v59 = vadd.f32 %v1080_v54, %v728_v58 }
 0x11d   :  { %v807_v60 = vpop.f32.mrb[8].mxu0 }
 0x11e   :  { %v808_v61 = vadd.f32 %v807_v60, %v768_v59  ;;  %v1096_v62 = vpop.f32.mrb[9].mxu0 }
 0x11f   :  { %v810_v63 = vpop.f32.mrb[10].mxu0 }
 0x120   :  { %v813_v0 = vmax.f32 %v808_v61, 0.0  ;;  %v1097_v1 = vpop.f32.mrb[11].mxu0 }
 0x122   :  { %v814_v2 = vpack.c.bf16 %v813_v0, %v813_v0 }
 0x124   :  { %1109 = vmatmul.mubr.msk.bf16.vlgmr.msra.gmra.mrb[8].mxu1 %vm860_vm2, %v814_v2 }
 0x1f7   :  { %v898_v4 = vpop.f32.mrb[8].mxu1 }
 0x1f8   :  { %v899_v5 = vadd.f32 %v989_v3, %v898_v4  ;;  %v1110_v6 = vpop.f32.mrb[9].mxu1 }
 0x1f9   :  { %v901_v7 = vpop.f32.mrb[10].mxu1 }
 0x1fa   :  { %1188 = vtanh.f32 %v899_v5  ;;  %v1111_v8 = vpop.f32.mrb[11].mxu1 }
 0x204   :  { %v1189_v9 = vpop.eup %1188 }
 0x205   :  { %906 = vst.msk [vmem:[#allocation2] sm:$0x3] %vm905_vm3, %v1189_v9 }
 0x206   :  { %1201 = shalt.err (!%p1198_p4)
}
 0x207   :  { %s1202_s10 = scalar_lea.hbm %s1490_s4, 32 }
 0x208   :  { %p1203_p5 = scmp.ne.s32.totalorder %s1490_s4, %s1202_s10  ;;  %p1206_p6 = scmp.lt.u32.totalorder %s1202_s10, %s1490_s4 }
 0x20a   :  { %p1208_p7 = pnand %p1206_p6, %p1203_p5 }
 0x20c   :  { %1211 = shalt.err (!%p1208_p7)
}
 0x20d   :  { %916 = dma.vmem_to_hbm [thread:$0]  %s914_s7, 32, %s1490_s4, [#allocation3]  }
 0x20e   :  { %1212 = dma.done.wait [#allocation3], 32  }
 0x20f   :  { %1213 = vsyncadd [#allocation3], 4294967264 }
 0x210   :  { %920 = vsyncpa [#allocation3], 1 }

</bundles_post_ra>
